<compile_context>
chip_gen: v5e
topology: v5e:2x2
jax: 0.10.0
libtpu: 0.0.40
codegen_flags: <defaults>
</compile_context>

<pallas_src>
import functools

import jax
import jax.numpy as jnp
from jax import lax
from jax.experimental import pallas as pl
from jax.experimental.pallas import tpu as pltpu

INPUT_DIM = 6
HIDDEN1 = 256
HIDDEN2 = 128
OUTPUT_DIM = 2


def _round_up(x, m):
    return (x + m - 1) // m * m


def _is_v5e():
    try:
        kind = jax.devices()[0].device_kind.lower()
    except Exception:
        return False
    return ("v5e" in kind) or ("v5 lite" in kind) or ("v5lite" in kind)


def _pick_batch_tile(batch, max_tile, align):
    """Batch-tile selection.

    * batch <= align: a single block covering the whole batch (block shape ==
      full array shape, so any batch size is layout-legal, no padding at all).
    * larger batches: `align`-multiple tiles (fills the MXU M width) with an
      even number of grid steps so v7x's two TensorCores stay balanced.  The
      ragged final block is handled by Pallas (clipped DMAs on load and store).
    """
    if batch <= align:
        return batch
    steps = max(2, pl.cdiv(batch, max_tile))
    steps = _round_up(steps, 2)            # even step count -> 2-TC balance (v7x)
    return min(_round_up(pl.cdiv(batch, steps), align), max_tile)


def _mlp_kernel(x_ref, w1_ref, b1_ref, w2_ref, b2_ref, w3_ref, b3_ref, o_ref,
                *, epilogue_dtype):
    # Whole hot path (3 matmuls + biases + ReLUs) fused, VMEM-resident per tile.
    # MXU operands bf16, accumulation f32, bias/ReLU in `epilogue_dtype`
    # (bf16 on v6e/v7x, f32 on v5e whose VPU has no bf16).
    x = x_ref[...].astype(jnp.bfloat16)                      # (tile, 6)

    h = jnp.dot(x, w1_ref[...], preferred_element_type=jnp.float32)
    h = jnp.maximum(h.astype(epilogue_dtype) + b1_ref[...], 0)
    h = h.astype(jnp.bfloat16)                               # (tile, 256)

    h = jnp.dot(h, w2_ref[...], preferred_element_type=jnp.float32)
    h = jnp.maximum(h.astype(epilogue_dtype) + b2_ref[...], 0)
    h = h.astype(jnp.bfloat16)                               # (tile, 128)

    # Layer 3 computed transposed so the kernel output is lane-dense
    # (OUTPUT_DIM, tile) -> full unmasked lane stores (vs. 2-of-128-lane
    # masked stores for a (tile, 2) output).
    y = lax.dot_general(w3_ref[...], h,
                        dimension_numbers=(((0,), (1,)), ((), ())),
                        preferred_element_type=jnp.float32)  # (2, tile)
    o_ref[...] = (y + b3_ref[...]).astype(o_ref.dtype)


@functools.partial(jax.jit, static_argnames=("max_tile",))
def forward_model(x, params, *, max_tile=None):
    """Pallas implementation of ForwardModel.forward.

    x: (B, INPUT_DIM) float32, any B >= 1 (no alignment requirement).
    params: dict with w1 (6,256), b1 (1,256), w2 (256,128), b2 (1,128),
            w3 (128,2), b3 (1,2), all float32.
    """
    B, D = x.shape
    assert D == INPUT_DIM

    v5e = _is_v5e()
    align = 128 if v5e else 256                 # MXU M width (v5e is 4x128^2)
    epilogue_dtype = jnp.float32 if v5e else jnp.bfloat16
    if max_tile is None:
        max_tile = 1024 if v5e else 2048

    tile = _pick_batch_tile(B, max_tile, align)
    grid = (pl.cdiv(B, tile),)

    # Weights pre-cast to bf16 (MXU-native, halves the weight DMA); biases in
    # the epilogue dtype.  b3 reshaped to (OUTPUT_DIM, 1) for the lane-dense
    # transposed layer 3.  These are tiny (~100 KB) one-off wrapper ops.
    w1 = params["w1"].astype(jnp.bfloat16)                      # (6, 256)
    w2 = params["w2"].astype(jnp.bfloat16)                      # (256, 128)
    w3 = params["w3"].astype(jnp.bfloat16)                      # (128, 2)
    b1 = params["b1"].astype(epilogue_dtype)                    # (1, 256)
    b2 = params["b2"].astype(epilogue_dtype)                    # (1, 128)
    b3 = params["b3"].reshape(OUTPUT_DIM, 1).astype(jnp.float32)  # (2, 1)

    resident = lambda a: pl.BlockSpec(a.shape, lambda i: (0, 0))  # grid-invariant

    flops = 2 * B * (INPUT_DIM * HIDDEN1 + HIDDEN1 * HIDDEN2 + HIDDEN2 * OUTPUT_DIM)
    bytes_accessed = (x.size * x.dtype.itemsize
                      + (w1.size + w2.size + w3.size) * 2
                      + (b1.size + b2.size) * b1.dtype.itemsize
                      + b3.size * 4
                      + B * OUTPUT_DIM * 4)

    out_t = pl.pallas_call(
        functools.partial(_mlp_kernel, epilogue_dtype=epilogue_dtype),
        out_shape=jax.ShapeDtypeStruct((OUTPUT_DIM, B), x.dtype),
        grid=grid,
        in_specs=[
            pl.BlockSpec((tile, INPUT_DIM), lambda i: (i, 0)),   # ragged last block OK
            resident(w1), resident(b1),
            resident(w2), resident(b2),
            resident(w3), resident(b3),
        ],
        out_specs=pl.BlockSpec((OUTPUT_DIM, tile), lambda i: (0, i)),
        compiler_params=pltpu.CompilerParams(
            dimension_semantics=("parallel",),
            vmem_limit_bytes=32 * 1024 * 1024,
        ),
        cost_estimate=pl.CostEstimate(
            flops=flops, transcendentals=0, bytes_accessed=bytes_accessed),
    )(x, w1, b1, w2, b2, w3, b3)

    # (2, B) -> (B, 2): a few-KB transpose, negligible vs. the kernel.
    return out_t.T


def init_params(key):
    """Deterministic init mimicking PyTorch's default nn.Linear init
    (uniform in +-1/sqrt(fan_in)).  Weights stored as (in, out)."""
    dims = [(INPUT_DIM, HIDDEN1), (HIDDEN1, HIDDEN2), (HIDDEN2, OUTPUT_DIM)]
    params = {}
    keys = jax.random.split(key, 2 * len(dims))
    for idx, (fan_in, fan_out) in enumerate(dims):
        bound = 1.0 / jnp.sqrt(fan_in)
        w = jax.random.uniform(
            keys[2 * idx], (fan_in, fan_out), jnp.float32, -bound, bound)
        b = jax.random.uniform(
            keys[2 * idx + 1], (1, fan_out), jnp.float32, -bound, bound)
        params[f"w{idx + 1}"] = w
        params[f"b{idx + 1}"] = b
    return params


def forward_model_ref_f32(x, params):
    h1 = jnp.maximum(x @ params["w1"] + params["b1"], 0.0)
    h2 = jnp.maximum(h1 @ params["w2"] + params["b2"], 0.0)
    return h2 @ params["w3"] + params["b3"]


def forward_model_ref_kernel_math(x, params, epilogue_dtype):
    # Mirrors the kernel numerics: bf16 MXU operands, f32 accumulation,
    # bias/ReLU in `epilogue_dtype`, final bias add in f32.
    dot = lambda a, b: jnp.dot(a.astype(jnp.bfloat16), b.astype(jnp.bfloat16),
                               preferred_element_type=jnp.float32)
    h1 = jnp.maximum(dot(x, params["w1"]).astype(epilogue_dtype)
                     + params["b1"].astype(epilogue_dtype), 0)
    h2 = jnp.maximum(dot(h1, params["w2"]).astype(epilogue_dtype)
                     + params["b2"].astype(epilogue_dtype), 0)
    return dot(h2, params["w3"]) + params["b3"]


if __name__ == "__main__":
    key = jax.random.PRNGKey(0)
    pkey, xkey = jax.random.split(key)
    params = init_params(pkey)

    epi = jnp.float32 if _is_v5e() else jnp.bfloat16

    # Small batch consistent with the module (input_dim=6 -> output_dim=2).
    B = 16
    x = jax.random.normal(xkey, (B, INPUT_DIM), jnp.float32)
    out = jax.block_until_ready(forward_model(x, params))
    assert out.shape == (B, OUTPUT_DIM)
    assert jnp.allclose(out, forward_model_ref_kernel_math(x, params, epi),
                        atol=2e-3, rtol=2e-3)
    assert jnp.allclose(out, forward_model_ref_f32(x, params),
                        atol=1e-1, rtol=1e-1)

    # Larger, non-aligned batch: multi-tile grid + ragged final block path.
    B2 = 600
    x2 = jax.random.normal(jax.random.PRNGKey(1), (B2, INPUT_DIM), jnp.float32)
    out2 = jax.block_until_ready(forward_model(x2, params))
    assert out2.shape == (B2, OUTPUT_DIM)
    assert jnp.allclose(out2, forward_model_ref_kernel_math(x2, params, epi),
                        atol=2e-3, rtol=2e-3)

    print("KERNEL_OK")
</pallas_src>

<mosaic_0001>
module attributes {stable_mosaic.version = 11 : i64} {
  func.func @_mlp_kernel(%arg0: i32, %arg1: memref<16x6xf32, #tpu.memory_space<vmem>>, %arg2: memref<6x256xbf16, #tpu.memory_space<vmem>>, %arg3: memref<1x256xbf16, #tpu.memory_space<vmem>>, %arg4: memref<256x128xbf16, #tpu.memory_space<vmem>>, %arg5: memref<1x128xbf16, #tpu.memory_space<vmem>>, %arg6: memref<128x2xbf16, #tpu.memory_space<vmem>>, %arg7: memref<2x1xf32, #tpu.memory_space<vmem>>, %arg8: memref<2x16xf32, #tpu.memory_space<vmem>>) attributes {dimension_semantics = [#tpu.dimension_semantics<parallel>], iteration_bounds = array<i64: 1>, scalar_prefetch = 0 : i64, scratch_operands = 0 : i64, tpu.core_type = #tpu.core_type<tc>, window_params = [{transform_indices = @transform_0, window_bounds = array<i64: 16, 6>}, {pipeline_mode = #tpu.pipeline_mode<synchronous>, transform_indices = @transform_1, window_bounds = array<i64: 6, 256>}, {pipeline_mode = #tpu.pipeline_mode<synchronous>, transform_indices = @transform_2, window_bounds = array<i64: 1, 256>}, {pipeline_mode = #tpu.pipeline_mode<synchronous>, transform_indices = @transform_3, window_bounds = array<i64: 256, 128>}, {pipeline_mode = #tpu.pipeline_mode<synchronous>, transform_indices = @transform_4, window_bounds = array<i64: 1, 128>}, {pipeline_mode = #tpu.pipeline_mode<synchronous>, transform_indices = @transform_5, window_bounds = array<i64: 128, 2>}, {pipeline_mode = #tpu.pipeline_mode<synchronous>, transform_indices = @transform_6, window_bounds = array<i64: 2, 1>}, {transform_indices = @transform_7, window_bounds = array<i64: 2, 16>}]} {
    %c0 = arith.constant 0 : index
    %c0_0 = arith.constant 0 : index
    %0 = vector.load %arg1[%c0, %c0_0] : memref<16x6xf32, #tpu.memory_space<vmem>>, vector<16x6xf32>
    %1 = arith.truncf %0 : vector<16x6xf32> to vector<16x6xbf16>
    %c0_1 = arith.constant 0 : index
    %c0_2 = arith.constant 0 : index
    %2 = vector.load %arg2[%c0_1, %c0_2] : memref<6x256xbf16, #tpu.memory_space<vmem>>, vector<6x256xbf16>
    %cst = arith.constant dense<0.000000e+00> : vector<16x256xf32>
    %3 = tpu.matmul %1, %2, %cst {dimension_numbers = #tpu.dot_dimension_numbers<[1], [0], [0], [1], [0, 0, 1, 1], [], []>} : vector<16x6xbf16>, vector<6x256xbf16>, vector<16x256xf32> -> vector<16x256xf32>
    %4 = arith.truncf %3 : vector<16x256xf32> to vector<16x256xbf16>
    %c0_3 = arith.constant 0 : index
    %c0_4 = arith.constant 0 : index
    %5 = vector.load %arg3[%c0_3, %c0_4] : memref<1x256xbf16, #tpu.memory_space<vmem>>, vector<1x256xbf16>
    %6 = vector.broadcast %5 : vector<1x256xbf16> to vector<16x256xbf16>
    %7 = arith.addf %4, %6 : vector<16x256xbf16>
    %cst_5 = arith.constant 0.000000e+00 : bf16
    %8 = vector.broadcast %cst_5 : bf16 to vector<16x256xbf16>
    %9 = arith.maximumf %7, %8 : vector<16x256xbf16>
    %c0_6 = arith.constant 0 : index
    %c0_7 = arith.constant 0 : index
    %10 = vector.load %arg4[%c0_6, %c0_7] : memref<256x128xbf16, #tpu.memory_space<vmem>>, vector<256x128xbf16>
    %cst_8 = arith.constant dense<0.000000e+00> : vector<16x128xf32>
    %11 = tpu.matmul %9, %10, %cst_8 {dimension_numbers = #tpu.dot_dimension_numbers<[1], [0], [0], [1], [0, 0, 1, 1], [], []>} : vector<16x256xbf16>, vector<256x128xbf16>, vector<16x128xf32> -> vector<16x128xf32>
    %12 = arith.truncf %11 : vector<16x128xf32> to vector<16x128xbf16>
    %c0_9 = arith.constant 0 : index
    %c0_10 = arith.constant 0 : index
    %13 = vector.load %arg5[%c0_9, %c0_10] : memref<1x128xbf16, #tpu.memory_space<vmem>>, vector<1x128xbf16>
    %14 = vector.broadcast %13 : vector<1x128xbf16> to vector<16x128xbf16>
    %15 = arith.addf %12, %14 : vector<16x128xbf16>
    %cst_11 = arith.constant 0.000000e+00 : bf16
    %16 = vector.broadcast %cst_11 : bf16 to vector<16x128xbf16>
    %17 = arith.maximumf %15, %16 : vector<16x128xbf16>
    %c0_12 = arith.constant 0 : index
    %c0_13 = arith.constant 0 : index
    %18 = vector.load %arg6[%c0_12, %c0_13] : memref<128x2xbf16, #tpu.memory_space<vmem>>, vector<128x2xbf16>
    %cst_14 = arith.constant dense<0.000000e+00> : vector<2x16xf32>
    %19 = tpu.matmul %18, %17, %cst_14 {dimension_numbers = #tpu.dot_dimension_numbers<[0], [1], [1], [0], [0, 1, 1, 0], [], []>} : vector<128x2xbf16>, vector<16x128xbf16>, vector<2x16xf32> -> vector<2x16xf32>
    %c0_15 = arith.constant 0 : index
    %c0_16 = arith.constant 0 : index
    %20 = vector.load %arg7[%c0_15, %c0_16] : memref<2x1xf32, #tpu.memory_space<vmem>>, vector<2x1xf32>
    %21 = vector.broadcast %20 : vector<2x1xf32> to vector<2x16xf32>
    %22 = arith.addf %19, %21 : vector<2x16xf32>
    %c0_17 = arith.constant 0 : index
    %c0_18 = arith.constant 0 : index
    %23 = vector.load %arg8[%c0_17, %c0_18] : memref<2x16xf32, #tpu.memory_space<vmem>>, vector<2x16xf32>
    tpu.vector_store %arg8[%c0_17, %c0_18], %22 {strides = array<i32>} : memref<2x16xf32, #tpu.memory_space<vmem>>, vector<2x16xf32>,
    return
  }
  func.func @transform_0(%arg0: i32) -> (i32, i32) {
    %c0_i32 = arith.constant 0 : i32
    %c0_i32_0 = arith.constant 0 : i32
    return %arg0, %c0_i32 : i32, i32
  }
  func.func @transform_1(%arg0: i32) -> (i32, i32) {
    %c0_i32 = arith.constant 0 : i32
    %c0_i32_0 = arith.constant 0 : i32
    %c0_i32_1 = arith.constant 0 : i32
    return %c0_i32, %c0_i32_0 : i32, i32
  }
  func.func @transform_2(%arg0: i32) -> (i32, i32) {
    %c0_i32 = arith.constant 0 : i32
    %c0_i32_0 = arith.constant 0 : i32
    %c0_i32_1 = arith.constant 0 : i32
    return %c0_i32, %c0_i32_0 : i32, i32
  }
  func.func @transform_3(%arg0: i32) -> (i32, i32) {
    %c0_i32 = arith.constant 0 : i32
    %c0_i32_0 = arith.constant 0 : i32
    %c0_i32_1 = arith.constant 0 : i32
    return %c0_i32, %c0_i32_0 : i32, i32
  }
  func.func @transform_4(%arg0: i32) -> (i32, i32) {
    %c0_i32 = arith.constant 0 : i32
    %c0_i32_0 = arith.constant 0 : i32
    %c0_i32_1 = arith.constant 0 : i32
    return %c0_i32, %c0_i32_0 : i32, i32
  }
  func.func @transform_5(%arg0: i32) -> (i32, i32) {
    %c0_i32 = arith.constant 0 : i32
    %c0_i32_0 = arith.constant 0 : i32
    %c0_i32_1 = arith.constant 0 : i32
    return %c0_i32, %c0_i32_0 : i32, i32
  }
  func.func @transform_6(%arg0: i32) -> (i32, i32) {
    %c0_i32 = arith.constant 0 : i32
    %c0_i32_0 = arith.constant 0 : i32
    %c0_i32_1 = arith.constant 0 : i32
    return %c0_i32, %c0_i32_0 : i32, i32
  }
  func.func @transform_7(%arg0: i32) -> (i32, i32) {
    %c0_i32 = arith.constant 0 : i32
    %c0_i32_0 = arith.constant 0 : i32
    return %c0_i32, %arg0 : i32, i32
  }
}

</mosaic_0001>

<bundles_post_ra>
// kernel: forward_model.1
= control target key start
LH: loop header
LB: loop body
LE: loop exit
PB: predicated region body
PF: predicated region fallthrough
CT: control target
= control target key end

     0   :  { %vm41_vm0 = vcmask 1042432   ;;  %s693_s0 = inlined_call_operand.vmem [shape: f32[16,6], index: 0, kind: input, shape index: {}]   ;;  %s694_s1 = inlined_call_operand.vmem [shape: bf16[6,256], index: 1, kind: input, shape index: {}]   ;;  %s695_s2 = inlined_call_operand.vmem [shape: bf16[1,256], index: 2, kind: input, shape index: {}]   ;;  %s696_s3 = inlined_call_operand.vmem [shape: bf16[256,128], index: 3, kind: input, shape index: {}]   ;;  %s697_s4 = inlined_call_operand.vmem [shape: bf16[1,128], index: 4, kind: input, shape index: {}]   ;;  %s698_s5 = inlined_call_operand.vmem [shape: bf16[128,2], index: 5, kind: input, shape index: {}]   ;;  %s699_s6 = inlined_call_operand.vmem [shape: f32[2,1], index: 6, kind: input, shape index: {}]   ;;  %s700_s7 = inlined_call_operand.hbm [shape: f32[2,16], index: 7, kind: output, shape index: {}]  }
   0x1   :  { %v31_v0 = vld [vmem:[%s694_s1] sm:$0x77]  ;;  %v508_v3 = vld [vmem:[%s696_s3 + $0x38] sm:$0xff]  ;;  %v29_v6 = vld [vmem:[%s693_s0 + $0x8] sm:$0xff] }
   0x2   :  { %v33_v1 = vunpack.c.l.b16 %v31_v0  ;;  %v34_v2 = vunpack.c.h.b16 %v31_v0  ;;  %v516_v4 = vld [vmem:[%s696_s3 + $0x78] sm:$0xff]  ;;  %v28_v5 = vld [vmem:[%s693_s0] sm:$0xff]  ;;  %239 = vmatpush.bf16.msra.mxu2 %v508_v3  ;;  %v507_v9 = vld [vmem:[%s696_s3 + $0x30] sm:$0xff] }
   0x3   :  { %253 = vmatpush.bf16.msra.mxu3 %v516_v4  ;;  %v515_v10 = vld [vmem:[%s696_s3 + $0x70] sm:$0xff] }
   0x4   :  { %v35_v7 = vpack.c.b16 %v33_v1, %v33_v1  ;;  %v36_v8 = vpack.c.b16 %v34_v2, %v34_v2 }
   0x5   :  { %12 = vsyncpa [#allocation3], 0  ;;  %v30_v13 = vpack.c.bf16 %v29_v6, %v28_v5  ;;  %vm37_vm1 = vcmask 48128   ;;  %v506_v14 = vld [vmem:[%s696_s3 + $0x28] sm:$0xff]  ;;  %v78_v16 = vld [vmem:[%s695_s2] sm:$0x3] }
   0x6   :  { %v43_v11 = vsel %vm41_vm0, %v35_v7, 0  ;;  %v46_v12 = vsel %vm41_vm0, %v36_v8, 0  ;;  %240 = vmatpush.bf16.msra.mxu2 %v507_v9  ;;  %v514_v15 = vld [vmem:[%s696_s3 + $0x68] sm:$0xff]  ;;  %80 = vst [vmem:[#allocation1] ss:$9 sm:$0xff] %v78_v16  ;;  %v505_v17 = vld [vmem:[%s696_s3 + $0x20] sm:$0xff] }
   0x7   :  { %55 = vmatpush.bf16.msra.mxu0 %v43_v11  ;;  %69 = vmatpush.bf16.msra.mxu1 %v46_v12  ;;  %v513_v18 = vld [vmem:[%s696_s3 + $0x60] sm:$0xff]  ;;  %v504_v19 = vld [vmem:[%s696_s3 + $0x18] sm:$0xff]  ;;  %v503_v22 = vld [vmem:[%s696_s3 + $0x10] sm:$0xff]  ;;  %v558_v0 = vmov 0   ;;  %s394_s9 = sshll.u32 %s700_s7, 4  ;;  %vm385_vm2 = vcmask 123904   ;;  %s395_s9 = int_to_ptr.hbm [resolvable:$true] %s394_s9 }
   0x8   :  { %254 = vmatpush.bf16.msra.mxu3 %v515_v10  ;;  %v512_v20 = vld [vmem:[%s696_s3 + $0x58] sm:$0xff]  ;;  %v517_v21 = vld [vmem:[%s698_s5] sm:$0xff]  ;;  %v511_v23 = vld [vmem:[%s696_s3 + $0x50] sm:$0xff]  ;;  %530 = vset.pattern.permute.xlu1 %v558_v0 }
   0x9   :  { %356 = vxpose.xlu0.c.b16.start [1/8] (narrow) %v517_v21, 16  ;;  %v502_v24 = vld [vmem:[%s696_s3 + $0x8] sm:$0xff]  ;;  %v501_v26 = vld [vmem:[%s696_s3] sm:$0xff]  ;;  %v519_v35 = vld [vmem:[%s698_s5 + $0x10] sm:$0xff] }
   0xa   :  { %403 = vmatmul.msk.bf16.vlgmr.msra.gmra.mxu0 %vm37_vm1, %v30_v13  ;;  %404 = vmatmul.msk.bf16.vlgmr.msra.gmra.mxu1 %vm37_vm1, %v30_v13  ;;  %v510_v25 = vld [vmem:[%s696_s3 + $0x48] sm:$0xff]  ;;  %v509_v27 = vld [vmem:[%s696_s3 + $0x40] sm:$0xff]  ;;  %v520_v58 = vld [vmem:[%s698_s5 + $0x18] sm:$0xff] }
   0xb   :  { %241 = vmatpush.bf16.msra.mxu2 %v506_v14  ;;  %v518_v28 = vld [vmem:[%s698_s5 + $0x8] sm:$0xff]  ;;  %v521_v59 = vld [vmem:[%s698_s5 + $0x20] sm:$0xff]  ;;  %v523_v61 = vld [vmem:[%s698_s5 + $0x30] sm:$0xff] }
   0xc   :  { %255 = vmatpush.bf16.msra.mxu3 %v514_v15  ;;  %v522_v60 = vld [vmem:[%s698_s5 + $0x28] sm:$0xff]  ;;  %v524_v62 = vld [vmem:[%s698_s5 + $0x38] sm:$0xff]  ;;  %v302_v63 = vld [vmem:[%s699_s6] sm:$0x3] }
   0xd   :  { %v81_v29 = vld [vmem:[#allocation1] sm:$0xff]  ;;  %v82_v30 = vld [vmem:[#allocation1 + $0x9] sm:$0xff]  ;;  %305 = vperm.xlu1 %530, %v302_v63  }
   0xe   :  { %v83_v31 = vpack.i.b16 %v81_v29, %v81_v29  ;;  %v86_v32 = vpack.i.b16 %v82_v30, %v82_v30  ;;  %v269_v1 = vld [vmem:[%s697_s4] sm:$0x1]  ;;  %s559_s4 = smov [#allocation2]  }
   0xf   :  { %242 = vmatpush.bf16.msra.mxu2 %v505_v17  ;;  %v271_v5 = vpack.i.b16 %v269_v1, %v269_v1  ;;  %s392_s5 = sshll.u32 %s559_s4, 4  ;;  %s393_s5 = int_to_ptr.vmem [resolvable:$true] %s392_s5 }
  0x10   :  { %256 = vmatpush.bf16.msra.mxu3 %v513_v18  ;;  %v85_v37 = vperm.slane %v83_v31, 0  ;;  %v88_v38 = vperm.slane %v86_v32, 0 }
  0x11   :  { %v273_v7 = vperm.slane %v271_v5, 0 }
  0x12   :  { %v93_v41 = vunpack.c.l.bf16 %v85_v37  ;;  %v94_v42 = vunpack.c.l.bf16 %v88_v38 }
  0x13   :  { %243 = vmatpush.bf16.msra.mxu2 %v504_v19  ;;  %v276_v11 = vunpack.c.l.bf16 %v273_v7 }
  0x14   :  { %257 = vmatpush.bf16.msra.mxu3 %v512_v20 }
  0x17   :  { %244 = vmatpush.bf16.msra.mxu2 %v503_v22 }
  0x18   :  { %258 = vmatpush.bf16.msra.mxu3 %v511_v23 }
  0x19   :  { %357 = vxpose.xlu0.c.b16.cont [2/8] (narrow) %v518_v28, 16 }
  0x1b   :  { %245 = vmatpush.bf16.msra.mxu2 %v502_v24 }
  0x1c   :  { %259 = vmatpush.bf16.msra.mxu3 %v510_v25 }
  0x1f   :  { %246 = vmatpush.bf16.msra.mxu2 %v501_v26 }
  0x20   :  { %260 = vmatpush.bf16.msra.mxu3 %v509_v27 }
  0x29   :  { %358 = vxpose.xlu0.c.b16.cont [3/8] (narrow) %v519_v35, 16 }
  0x39   :  { %359 = vxpose.xlu0.c.b16.cont [4/8] (narrow) %v520_v58, 16 }
  0x49   :  { %360 = vxpose.xlu0.c.b16.cont [5/8] (narrow) %v521_v59, 16 }
  0x59   :  { %361 = vxpose.xlu0.c.b16.cont [6/8] (narrow) %v522_v60, 16 }
  0x69   :  { %362 = vxpose.xlu0.c.b16.cont [7/8] (narrow) %v523_v61, 16 }
  0x79   :  { %363 = vxpose.xlu0.c.b16.end [8/8] (narrow) %v524_v62, 16 }
  0x7f   :  { %v306_v21 = vpop.permute.xlu1 %305 }
  0x87   :  { %v57_v33 = vpop.f32.mrf.mxu0  ;;  %v71_v34 = vpop.f32.mrf.mxu1 }
  0x88   :  { %v76_v36 = vpack.c.bf16 %v71_v34, %v57_v33 }
  0x8a   :  { %v89_v39 = vunpack.c.l.bf16 %v76_v36  ;;  %v90_v40 = vunpack.c.h.bf16 %v76_v36 }
  0x8c   :  { %v95_v48 = vadd.f32 %v93_v41, %v89_v39  ;;  %v96_v49 = vadd.f32 %v94_v42, %v90_v40 }
  0x8e   :  { %v105_v52 = vmax.f32 %v95_v48, 0.0  ;;  %v106_v54 = vmax.f32 %v96_v49, 0.0 }
  0x8f   :  { %v59_v43 = vpop.f32.mrf.mxu0  ;;  %v73_v44 = vpop.f32.mrf.mxu1 }
  0x90   :  { %v77_v45 = vpack.c.bf16 %v73_v44, %v59_v43 }
  0x92   :  { %v91_v46 = vunpack.c.l.bf16 %v77_v45  ;;  %v92_v47 = vunpack.c.h.bf16 %v77_v45 }
  0x94   :  { %v97_v50 = vadd.f32 %v93_v41, %v91_v46  ;;  %v98_v51 = vadd.f32 %v94_v42, %v92_v47 }
  0x96   :  { %v107_v53 = vmax.f32 %v97_v50, 0.0  ;;  %v108_v55 = vmax.f32 %v98_v51, 0.0 }
  0x98   :  { %v109_v56 = vpack.c.bf16 %v107_v53, %v105_v52  ;;  %v110_v57 = vpack.c.bf16 %v108_v55, %v106_v54 }
  0x9a   :  { %247 = vmatmul.bf16.vlgmr.msra.gmra.mxu2 %v109_v56  ;;  %261 = vmatmul.bf16.vlgmr.msra.gmra.mxu3 %v110_v57 }
  0xb5   :  { %v364_v20 = vpop.trf.xlu0 }
  0xe0   :  { %531 = vset.pattern.permute.xlu0 %v558_v0 }
 0x11d   :  { %v248_v2 = vpop.f32.mrf.mxu2  ;;  %v262_v3 = vpop.f32.mrf.mxu3 }
 0x11e   :  { %v263_v4 = vadd.f32 %v262_v3, %v248_v2 }
 0x120   :  { %v267_v6 = vpack.c.bf16 %v263_v4, %v263_v4 }
 0x122   :  { %v274_v10 = vunpack.c.l.bf16 %v267_v6 }
 0x124   :  { %v277_v14 = vadd.f32 %v276_v11, %v274_v10 }
 0x125   :  { %v250_v8 = vpop.f32.mrf.mxu2  ;;  %v264_v9 = vpop.f32.mrf.mxu3 }
 0x126   :  { %v265_v12 = vadd.f32 %v264_v9, %v250_v8  ;;  %v283_v17 = vmax.f32 %v277_v14, 0.0 }
 0x128   :  { %v268_v13 = vpack.c.bf16 %v265_v12, %v265_v12 }
 0x12a   :  { %v275_v15 = vunpack.c.l.bf16 %v268_v13 }
 0x12c   :  { %v278_v16 = vadd.f32 %v276_v11, %v275_v15 }
 0x12e   :  { %v284_v18 = vmax.f32 %v278_v16, 0.0 }
 0x130   :  { %v285_v19 = vpack.c.bf16 %v284_v18, %v283_v17 }
 0x132   :  { %379 = vmatpush.bf16.xpose.msrb.mxu0 %v285_v19 }
 0x139   :  { %380 = vmatmul.bf16.vlgmr.msrb.gmra.mxu0 %v364_v20 }
 0x1b6   :  { %v381_v22 = vpop.f32.mrf.mxu0 }
 0x1b7   :  { %v382_v23 = vadd.f32 %v381_v22, %v306_v21 }
 0x1b9   :  { %386 = vst.msk [vmem:[#allocation2] sm:$0x3] %vm385_vm2, %v382_v23 }
 0x1ba   :  { %397 = dma.vmem_to_hbm [thread:$0]  %s393_s5, 32, %s395_s9, [#allocation3]  }
 0x1be   :  { %v383_v24 = vpop.f32.mrf.mxu0 }
 0x1bf   :  { %556 = dma.done.wait [#allocation3], 32  }
 0x1c0   :  { %557 = vsyncadd [#allocation3], 4294967264 }
 0x1c1   :  { %402 = vsyncpa [#allocation3], 1 }

</bundles_post_ra>
